<compile_context>
chip_gen: v7x
topology: tpu7x:2x2x1
jax: 0.10.0
libtpu: 0.0.40
codegen_flags: <defaults>
</compile_context>

<pallas_src>
import functools

import jax
import jax.numpy as jnp
from jax.experimental import pallas as pl
from jax.experimental.pallas import tpu as pltpu

LANES = 128
MAX_TILE_ROWS = 8192          # (8192, 128) f32 = 4 MiB per input block.
_F32 = jnp.float32


def _detect_tensorcores():
    """Best-effort TensorCore count (2 on v7x, 1 on v5e/v6e); safe fallback 1."""
    try:
        info = pltpu.get_tpu_info()
    except Exception:
        return 1
    for name in ("num_cores", "core_count", "num_tensorcores",
                 "tensorcores_per_chip", "cores_per_chip"):
        v = getattr(info, name, None)
        if isinstance(v, int) and v >= 1:
            return v
    return 1


def _partial_sums_jnp(x, t):
    """Plain-JAX partial sums for tiny inputs / the <128-element lane tail."""
    s = jax.nn.sigmoid(x.astype(_F32))
    tf = t.astype(_F32)
    return jnp.sum(s * tf), jnp.sum(s + tf)


def _iou_kernel(x_ref, t_ref, inter_ref, total_ref, inter_acc, total_acc,
                *, total_rows, tile_rows, blocks_per_split, need_mask):
    """Per-split accumulation of sum(sigmoid(x)*t) and sum(sigmoid(x)+t)."""
    c = pl.program_id(0)          # "parallel" split axis (megacore on v7x)
    i = pl.program_id(1)          # "arbitrary" reduction axis
    fold = tile_rows // 8         # tile_rows is always a multiple of 8

    @pl.when(i == 0)
    def _init():
        inter_acc[...] = jnp.zeros_like(inter_acc)
        total_acc[...] = jnp.zeros_like(total_acc)

    # DMA at native dtype; cast to f32 on the VPU.
    xf = x_ref[...].astype(jnp.float32)
    tf = t_ref[...].astype(jnp.float32)
    # sigmoid(x) = 0.5*(tanh(x/2)+1): one EUP transcendental + 2 VPU ops,
    # no full-precision divide.
    s = 0.5 * (jnp.tanh(0.5 * xf) + 1.0)

    prod = s * tf
    ssum = s + tf

    def _accumulate(p, q):
        # Sublane-preserving fold (tile_rows,128) -> (8,128): pure VPU vreg-tree
        # adds into one-vreg accumulators.  No per-step cross-lane reduce, no
        # full-tile accumulator load/store traffic.
        inter_acc[...] += jnp.sum(p.reshape(fold, 8, LANES), axis=0)
        total_acc[...] += jnp.sum(q.reshape(fold, 8, LANES), axis=0)

    if need_mask:
        base_row = (c * blocks_per_split + i) * tile_rows

        @pl.when(base_row + tile_rows <= total_rows)
        def _full_block():
            _accumulate(prod, ssum)

        @pl.when(base_row + tile_rows > total_rows)
        def _tail_block():
            # Only the last real (partial) block and clamped phantom blocks pay
            # for the mask; interior blocks take the unmasked path above.
            # Undefined bytes past the array boundary flow through tanh but are
            # discarded by the select.
            row = jax.lax.broadcasted_iota(jnp.int32, (tile_rows, LANES), 0)
            valid = (base_row + row) < total_rows
            _accumulate(jnp.where(valid, prod, 0.0),
                        jnp.where(valid, ssum, 0.0))
    else:
        _accumulate(prod, ssum)

    @pl.when(i == pl.num_programs(1) - 1)
    def _finalize():
        # Write the vreg-sized partials; the tiny cross-lane collapse happens
        # in the wrapper (one jnp.sum over (splits, 8, 128)).
        inter_ref[...] = inter_acc[...].reshape(inter_ref.shape)
        total_ref[...] = total_acc[...].reshape(total_ref.shape)


def iou_loss(inputs, targets, smooth=1e-05, *,
             max_tile_rows=MAX_TILE_ROWS, splits=None):
    """Pallas implementation of IoULoss.forward (PyTorch semantics)."""
    x = jnp.ravel(inputs)
    t = jnp.ravel(targets)
    n = x.shape[0]

    x_item = jnp.dtype(x.dtype).itemsize
    t_item = jnp.dtype(t.dtype).itemsize
    # Packed sub-f32 dtypes tile as (16,128)/(32,128): round row tiles accordingly.
    packing = max(8, 32 // max(1, min(x_item, t_item)))

    rows = n // LANES
    rem = n - rows * LANES

    inter = jnp.float32(0.0)
    total = jnp.float32(0.0)

    if rows < packing:
        # Tiny input: not worth a kernel launch.
        pi, pt = _partial_sums_jnp(x, t)
        inter = inter + pi
        total = total + pt
    else:
        if rem:
            # <128-element lane remainder summed with plain jnp (no O(N) pad pass).
            pi, pt = _partial_sums_jnp(x[rows * LANES:], t[rows * LANES:])
            inter = inter + pi
            total = total + pt
            x_main = x[: rows * LANES]
            t_main = t[: rows * LANES]
        else:
            x_main, t_main = x, t
        x2 = x_main.reshape(rows, LANES)
        t2 = t_main.reshape(rows, LANES)

        # Largest legal row tile: multiple of `packing`, capped by max_tile_rows,
        # never larger than the array's row count.
        tile_cap = max(packing, (max_tile_rows // packing) * packing)
        tile_rows = min(tile_cap, (rows // packing) * packing)
        n_blocks = -(-rows // tile_rows)

        if splits is None:
            splits = 2 if (_detect_tensorcores() >= 2 and n_blocks >= 2) else 1
        splits = max(1, min(int(splits), n_blocks))
        bpc = -(-n_blocks // splits)                      # blocks per split
        need_mask = (splits * bpc * tile_rows) != rows
        last_block = n_blocks - 1

        if splits * bpc == n_blocks:
            in_map = lambda c, i: (c * bpc + i, 0)
        else:
            # Phantom trailing blocks (only when splitting unevenly) are clamped
            # (never an OOB DMA) and zeroed by the gated in-kernel mask.
            in_map = lambda c, i: (jnp.minimum(c * bpc + i, last_block), 0)

        kernel = functools.partial(
            _iou_kernel,
            total_rows=rows,
            tile_rows=tile_rows,
            blocks_per_split=bpc,
            need_mask=need_mask,
        )

        # VMEM budget: 2 inputs x 2 pipeline buffers x one block, plus vreg-sized
        # accumulators/outputs.  Raise the scoped limit explicitly so 8K-row f32
        # tiles also fit under v5e's 16 MiB scoped default.
        block_in_bytes = tile_rows * LANES * (x_item + t_item)
        vmem_needed = 2 * block_in_bytes + 6 * 8 * LANES * 4
        vmem_limit = int(min(48 << 20,
                             max(16 << 20, vmem_needed * 3 // 2 + (1 << 20))))

        cost = pl.CostEstimate(
            flops=int(5 * rows * LANES),
            transcendentals=int(rows * LANES),
            bytes_accessed=int(rows * LANES * (x_item + t_item)),
        )

        inter_p, total_p = pl.pallas_call(
            kernel,
            out_shape=(
                jax.ShapeDtypeStruct((splits, 8, LANES), _F32),
                jax.ShapeDtypeStruct((splits, 8, LANES), _F32),
            ),
            grid_spec=pltpu.PrefetchScalarGridSpec(
                num_scalar_prefetch=0,
                grid=(splits, bpc),
                in_specs=[
                    pl.BlockSpec((tile_rows, LANES), in_map),
                    pl.BlockSpec((tile_rows, LANES), in_map),
                ],
                out_specs=[
                    pl.BlockSpec((1, 8, LANES), lambda c, i: (c, 0, 0)),
                    pl.BlockSpec((1, 8, LANES), lambda c, i: (c, 0, 0)),
                ],
                scratch_shapes=[
                    pltpu.VMEM((8, LANES), _F32),
                    pltpu.VMEM((8, LANES), _F32),
                ],
            ),
            compiler_params=pltpu.CompilerParams(
                dimension_semantics=("parallel", "arbitrary"),
                vmem_limit_bytes=vmem_limit,
            ),
            cost_estimate=cost,
        )(x2, t2)

        inter = inter + jnp.sum(inter_p)
        total = total + jnp.sum(total_p)

    # Tiny scalar glue (matches the PyTorch module's final arithmetic).
    union = total - inter
    iou = (inter + smooth) / (union + smooth)
    return 1.0 - iou


def _iou_loss_ref(inputs, targets, smooth=1e-05):
    x = jax.nn.sigmoid(inputs.astype(_F32)).ravel()
    t = targets.astype(_F32).ravel()
    inter = jnp.sum(x * t)
    total = jnp.sum(x + t)
    union = total - inter
    return 1.0 - (inter + smooth) / (union + smooth)


if __name__ == "__main__":
    key = jax.random.PRNGKey(0)
    k1, k2, k3, k4 = jax.random.split(key, 4)

    # Primary case: NCHW logits + binary mask, exact (rows, 128) fit.
    x = jax.random.normal(k1, (2, 4, 16, 16), dtype=jnp.float32)
    tgt = (jax.random.uniform(k2, (2, 4, 16, 16)) > 0.5).astype(jnp.float32)
    loss = iou_loss(x, tgt)
    jax.block_until_ready(loss)
    ref = _iou_loss_ref(x, tgt)
    assert jnp.allclose(loss, ref, atol=1e-4, rtol=1e-4), (loss, ref)

    # Irregular size: exercises the lane-remainder jnp tail, gated in-kernel
    # block-tail masking, multi-block reduction and (when 2 TCs are present)
    # the parallel split with a clamped phantom block.
    xb = jax.random.normal(k3, (2, 3, 21, 21), dtype=jnp.float32)
    tb = (jax.random.uniform(k4, (2, 3, 21, 21)) > 0.5).astype(jnp.float32)
    lb = iou_loss(xb, tb, max_tile_rows=8)
    jax.block_until_ready(lb)
    rb = _iou_loss_ref(xb, tb)
    assert jnp.allclose(lb, rb, atol=1e-4, rtol=1e-4), (lb, rb)

    # Native bf16 inputs: exercises the packed-dtype (16,128) tile rounding and
    # the in-kernel cast (halved HBM traffic path).
    xh = x.astype(jnp.bfloat16)
    lh = iou_loss(xh, tgt)
    jax.block_until_ready(lh)
    rh = _iou_loss_ref(xh, tgt)
    assert jnp.allclose(lh, rh, atol=1e-3, rtol=1e-3), (lh, rh)

    print("KERNEL_OK")
</pallas_src>

<mosaic_0001>
module attributes {stable_mosaic.version = 11 : i64} {
  func.func @_iou_kernel(%arg0: i32, %arg1: i32, %arg2: memref<16x128xf32, #tpu.memory_space<vmem>>, %arg3: memref<16x128xf32, #tpu.memory_space<vmem>>, %arg4: memref<1x8x128xf32, #tpu.memory_space<vmem>>, %arg5: memref<1x8x128xf32, #tpu.memory_space<vmem>>, %arg6: memref<8x128xf32, #tpu.memory_space<vmem>>, %arg7: memref<8x128xf32, #tpu.memory_space<vmem>>) attributes {dimension_semantics = [#tpu.dimension_semantics<parallel>, #tpu.dimension_semantics<arbitrary>], iteration_bounds = array<i64: 1, 1>, scalar_prefetch = 0 : i64, scratch_operands = 2 : i64, tpu.core_type = #tpu.core_type<tc>, window_params = [{transform_indices = @transform_0, window_bounds = array<i64: 16, 128>}, {transform_indices = @transform_1, window_bounds = array<i64: 16, 128>}, {transform_indices = @transform_2, window_bounds = array<i64: 1, 8, 128>}, {transform_indices = @transform_3, window_bounds = array<i64: 1, 8, 128>}]} {
    %c0_i32 = arith.constant 0 : i32
    %0 = arith.cmpi eq, %arg1, %c0_i32 : i32
    %1 = arith.extui %0 : i1 to i32
    %c0_i32_0 = arith.constant 0 : i32
    %2 = arith.cmpi ne, %1, %c0_i32_0 : i32
    scf.if %2 {
      %cst_18 = arith.constant 0.000000e+00 : f32
      %27 = vector.broadcast %cst_18 : f32 to vector<8x128xf32>
      %c0_19 = arith.constant 0 : index
      %c0_20 = arith.constant 0 : index
      %28 = vector.load %arg6[%c0_19, %c0_20] : memref<8x128xf32, #tpu.memory_space<vmem>>, vector<8x128xf32>
      tpu.vector_store %arg6[%c0_19, %c0_20], %27 {strides = array<i32>} : memref<8x128xf32, #tpu.memory_space<vmem>>, vector<8x128xf32>,
      %cst_21 = arith.constant 0.000000e+00 : f32
      %29 = vector.broadcast %cst_21 : f32 to vector<8x128xf32>
      %c0_22 = arith.constant 0 : index
      %c0_23 = arith.constant 0 : index
      %30 = vector.load %arg7[%c0_22, %c0_23] : memref<8x128xf32, #tpu.memory_space<vmem>>, vector<8x128xf32>
      tpu.vector_store %arg7[%c0_22, %c0_23], %29 {strides = array<i32>} : memref<8x128xf32, #tpu.memory_space<vmem>>, vector<8x128xf32>,
    } else {
    }
    %c0 = arith.constant 0 : index
    %c0_1 = arith.constant 0 : index
    %3 = vector.load %arg2[%c0, %c0_1] : memref<16x128xf32, #tpu.memory_space<vmem>>, vector<16x128xf32>
    %c0_2 = arith.constant 0 : index
    %c0_3 = arith.constant 0 : index
    %4 = vector.load %arg3[%c0_2, %c0_3] : memref<16x128xf32, #tpu.memory_space<vmem>>, vector<16x128xf32>
    %cst = arith.constant 5.000000e-01 : f32
    %5 = vector.broadcast %cst : f32 to vector<16x128xf32>
    %6 = arith.mulf %5, %3 : vector<16x128xf32>
    %7 = math.tanh %6 : vector<16x128xf32>
    %cst_4 = arith.constant 1.000000e+00 : f32
    %8 = vector.broadcast %cst_4 : f32 to vector<16x128xf32>
    %9 = arith.addf %7, %8 : vector<16x128xf32>
    %cst_5 = arith.constant 5.000000e-01 : f32
    %10 = vector.broadcast %cst_5 : f32 to vector<16x128xf32>
    %11 = arith.mulf %10, %9 : vector<16x128xf32>
    %12 = arith.mulf %11, %4 : vector<16x128xf32>
    %13 = arith.addf %11, %4 : vector<16x128xf32>
    %c0_6 = arith.constant 0 : index
    %c0_7 = arith.constant 0 : index
    %14 = vector.load %arg6[%c0_6, %c0_7] : memref<8x128xf32, #tpu.memory_space<vmem>>, vector<8x128xf32>
    %15 = vector.shape_cast %12 : vector<16x128xf32> to vector<2x8x128xf32>
    %cst_8 = arith.constant dense<0.000000e+00> : vector<8x128xf32>
    %16 = vector.multi_reduction <add>, %15, %cst_8 [0] : vector<2x8x128xf32> to vector<8x128xf32>
    %17 = arith.addf %14, %16 : vector<8x128xf32>
    %c0_9 = arith.constant 0 : index
    %c0_10 = arith.constant 0 : index
    %18 = vector.load %arg6[%c0_9, %c0_10] : memref<8x128xf32, #tpu.memory_space<vmem>>, vector<8x128xf32>
    tpu.vector_store %arg6[%c0_9, %c0_10], %17 {strides = array<i32>} : memref<8x128xf32, #tpu.memory_space<vmem>>, vector<8x128xf32>,
    %c0_11 = arith.constant 0 : index
    %c0_12 = arith.constant 0 : index
    %19 = vector.load %arg7[%c0_11, %c0_12] : memref<8x128xf32, #tpu.memory_space<vmem>>, vector<8x128xf32>
    %20 = vector.shape_cast %13 : vector<16x128xf32> to vector<2x8x128xf32>
    %cst_13 = arith.constant dense<0.000000e+00> : vector<8x128xf32>
    %21 = vector.multi_reduction <add>, %20, %cst_13 [0] : vector<2x8x128xf32> to vector<8x128xf32>
    %22 = arith.addf %19, %21 : vector<8x128xf32>
    %c0_14 = arith.constant 0 : index
    %c0_15 = arith.constant 0 : index
    %23 = vector.load %arg7[%c0_14, %c0_15] : memref<8x128xf32, #tpu.memory_space<vmem>>, vector<8x128xf32>
    tpu.vector_store %arg7[%c0_14, %c0_15], %22 {strides = array<i32>} : memref<8x128xf32, #tpu.memory_space<vmem>>, vector<8x128xf32>,
    %c0_i32_16 = arith.constant 0 : i32
    %24 = arith.cmpi eq, %arg1, %c0_i32_16 : i32
    %25 = arith.extui %24 : i1 to i32
    %c0_i32_17 = arith.constant 0 : i32
    %26 = arith.cmpi ne, %25, %c0_i32_17 : i32
    scf.if %26 {
      %c0_18 = arith.constant 0 : index
      %c0_19 = arith.constant 0 : index
      %27 = vector.load %arg6[%c0_18, %c0_19] : memref<8x128xf32, #tpu.memory_space<vmem>>, vector<8x128xf32>
      %28 = vector.shape_cast %27 : vector<8x128xf32> to vector<1x8x128xf32>
      %c0_20 = arith.constant 0 : index
      %c0_21 = arith.constant 0 : index
      %c0_22 = arith.constant 0 : index
      %29 = vector.load %arg4[%c0_20, %c0_21, %c0_22] : memref<1x8x128xf32, #tpu.memory_space<vmem>>, vector<1x8x128xf32>
      tpu.vector_store %arg4[%c0_20, %c0_21, %c0_22], %28 {strides = array<i32>} : memref<1x8x128xf32, #tpu.memory_space<vmem>>, vector<1x8x128xf32>,
      %c0_23 = arith.constant 0 : index
      %c0_24 = arith.constant 0 : index
      %30 = vector.load %arg7[%c0_23, %c0_24] : memref<8x128xf32, #tpu.memory_space<vmem>>, vector<8x128xf32>
      %31 = vector.shape_cast %30 : vector<8x128xf32> to vector<1x8x128xf32>
      %c0_25 = arith.constant 0 : index
      %c0_26 = arith.constant 0 : index
      %c0_27 = arith.constant 0 : index
      %32 = vector.load %arg5[%c0_25, %c0_26, %c0_27] : memref<1x8x128xf32, #tpu.memory_space<vmem>>, vector<1x8x128xf32>
      tpu.vector_store %arg5[%c0_25, %c0_26, %c0_27], %31 {strides = array<i32>} : memref<1x8x128xf32, #tpu.memory_space<vmem>>, vector<1x8x128xf32>,
    } else {
    }
    return
  }
  func.func @transform_0(%arg0: i32, %arg1: i32) -> (i32, i32) {
    %c1_i32 = arith.constant 1 : i32
    %0 = arith.muli %arg0, %c1_i32 : i32
    %1 = arith.addi %0, %arg1 : i32
    %c0_i32 = arith.constant 0 : i32
    %c0_i32_0 = arith.constant 0 : i32
    return %1, %c0_i32 : i32, i32
  }
  func.func @transform_1(%arg0: i32, %arg1: i32) -> (i32, i32) {
    %c1_i32 = arith.constant 1 : i32
    %0 = arith.muli %arg0, %c1_i32 : i32
    %1 = arith.addi %0, %arg1 : i32
    %c0_i32 = arith.constant 0 : i32
    %c0_i32_0 = arith.constant 0 : i32
    return %1, %c0_i32 : i32, i32
  }
  func.func @transform_2(%arg0: i32, %arg1: i32) -> (i32, i32, i32) {
    %c0_i32 = arith.constant 0 : i32
    %c0_i32_0 = arith.constant 0 : i32
    %c0_i32_1 = arith.constant 0 : i32
    return %arg0, %c0_i32, %c0_i32_0 : i32, i32, i32
  }
  func.func @transform_3(%arg0: i32, %arg1: i32) -> (i32, i32, i32) {
    %c0_i32 = arith.constant 0 : i32
    %c0_i32_0 = arith.constant 0 : i32
    %c0_i32_1 = arith.constant 0 : i32
    return %arg0, %c0_i32, %c0_i32_0 : i32, i32, i32
  }
}

</mosaic_0001>

<bundles_post_ra>
// kernel: tpu_custom_call.1
= control target key start
LH: loop header
LB: loop body
LE: loop exit
PB: predicated region body
PF: predicated region fallthrough
CT: control target
= control target key end

     0   :  { %9 = vsyncpa [#allocation5], 0  ;;  %s302_s0 = inlined_call_operand.hbm [shape: f32[16,128], index: 0, kind: input, shape index: {}]   ;;  %s303_s1 = inlined_call_operand.hbm [shape: f32[16,128], index: 1, kind: input, shape index: {}]   ;;  %s304_s2 = inlined_call_operand.hbm [shape: f32[1,8,128], index: 2, kind: output, shape index: {0}]   ;;  %s305_s3 = inlined_call_operand.hbm [shape: f32[1,8,128], index: 3, kind: output, shape index: {1}]  }
   0x1   :  { %10 = vsyncpa [#allocation8], 0 }
   0x2   :  { %11 = vsyncpa [#allocation6], 0 }
   0x3   :  { %12 = vsyncpa [#allocation11], 0  ;;  %s228_s12 = smov [#allocation4]   ;;  %s132_s16 = scalar_lea.hbm %s302_s0, 256 }
   0x4   :  { %s22_s13 = sshll.u32 %s228_s12, 4  ;;  %p133_p0 = scmp.ne.s32.totalorder %s302_s0, %s132_s16  ;;  %s23_s13 = int_to_ptr.vmem [resolvable:$true] %s22_s13 }
   0x5   :  { %p136_p1 = scmp.lt.u32.totalorder %s132_s16, %s302_s0 }
   0x7   :  { %p138_p2 = pnand %p136_p1, %p133_p0 }
   0x9   :  { %141 = shalt.err (!%p138_p2)
}
   0xa   :  { %s142_s21 = scalar_lea.vmem %s23_s13, 256  ;;  %p147_p4 = scmp.lt.s32.totalorder %s23_s13, %s23_s13 }
   0xb   :  { %p143_p3 = scmp.ne.s32.totalorder %s23_s13, %s142_s21  ;;  %p148_p5 = scmp.lt.s32.totalorder %s142_s21, %s142_s21 }
   0xd   :  { %p149_p6 = por %p148_p5, %p147_p4 }
   0xf   :  { %p150_p7 = pnand %p149_p6, %p143_p3 }
  0x11   :  { %153 = shalt.err (!%p150_p7)
}
  0x12   :  { %s229_s22 = smov 128   ;;  %s230_s23 = smov 8  }
  0x13   :  { %28 = dma.hbm_to_vmem [thread:$0]  %s302_s0, 256, %s23_s13, [#allocation5], %s229_s22, %s229_s22, %s230_s23  }
  0x14   :  { %s231_s26 = smov [#allocation7]   ;;  %s154_s30 = scalar_lea.hbm %s303_s1, 256 }
  0x15   :  { %s38_s27 = sshll.u32 %s231_s26, 4  ;;  %p155_p8 = scmp.ne.s32.totalorder %s303_s1, %s154_s30  ;;  %s39_s27 = int_to_ptr.vmem [resolvable:$true] %s38_s27 }
  0x16   :  { %p158_p9 = scmp.lt.u32.totalorder %s154_s30, %s303_s1 }
  0x18   :  { %p160_p10 = pnand %p158_p9, %p155_p8 }
  0x1a   :  { %163 = shalt.err (!%p160_p10)
}
  0x1b   :  { %s164_s8 = scalar_lea.vmem %s39_s27, 256  ;;  %p169_p12 = scmp.lt.s32.totalorder %s39_s27, %s39_s27 }
  0x1c   :  { %p165_p11 = scmp.ne.s32.totalorder %s39_s27, %s164_s8  ;;  %p170_p13 = scmp.lt.s32.totalorder %s164_s8, %s164_s8 }
  0x1e   :  { %p171_p0 = por %p170_p13, %p169_p12 }
  0x20   :  { %p172_p1 = pnand %p171_p0, %p165_p11 }
  0x22   :  { %175 = shalt.err (!%p172_p1)
}
  0x23   :  { %44 = dma.hbm_to_vmem [thread:$0]  %s303_s1, 256, %s39_s27, [#allocation8], %s229_s22, %s229_s22, %s230_s23  }
  0x24   :  { %220 = dma.done.wait [#allocation5], 256  }
  0x25   :  { %221 = vsyncadd [#allocation5], 4294967040 }
  0x26   :  { %222 = dma.done.wait [#allocation8], 256  }
  0x27   :  { %223 = vsyncadd [#allocation8], 4294967040  ;;  %v61_v0 = vld [vmem:[#allocation4] sm:$0xff]  ;;  %v62_v1 = vld [vmem:[#allocation4 + $0x8] sm:$0xff]  ;;  %s232_s1 = smov [#allocation9]   ;;  %s233_s11 = smov [#allocation10]  }
  0x28   :  { %v65_v2 = vmul.f32 0.5, %v61_v0  ;;  %v66_v3 = vmul.f32 0.5, %v62_v1  ;;  %v63_v7 = vld [vmem:[#allocation7] sm:$0xff]  ;;  %v64_v9 = vld [vmem:[#allocation7 + $0x8] sm:$0xff]  ;;  %s98_s10 = sshll.u32 %s232_s1, 4  ;;  %s108_s12 = sshll.u32 %s233_s11, 4  ;;  %s99_s10 = int_to_ptr.vmem [resolvable:$true] %s98_s10  ;;  %s109_s12 = int_to_ptr.vmem [resolvable:$true] %s108_s12 }
  0x29   :  { %s176_s13 = scalar_lea.vmem %s99_s10, 128  ;;  %p181_p3 = scmp.lt.s32.totalorder %s99_s10, %s99_s10 }
  0x2a   :  { %128 = vtanh.f32 %v65_v2  ;;  %p177_p2 = scmp.ne.s32.totalorder %s99_s10, %s176_s13  ;;  %p182_p4 = scmp.lt.s32.totalorder %s176_s13, %s176_s13 }
  0x2b   :  { %130 = vtanh.f32 %v66_v3 }
  0x2c   :  { %p183_p5 = por %p182_p4, %p181_p3 }
  0x2e   :  { %p184_p6 = pnand %p183_p5, %p177_p2 }
  0x34   :  { %v129_v4 = vpop.eup %128 }
  0x35   :  { %v131_v5 = vpop.eup %130  ;;  %v69_v6 = vadd.f32 1.0, %v129_v4 }
  0x36   :  { %v70_v8 = vadd.f32 1.0, %v131_v5 }
  0x37   :  { %v71_v10 = vmul.f32 0.5, %v69_v6 }
  0x38   :  { %v72_v11 = vmul.f32 0.5, %v70_v8 }
  0x39   :  { %v73_v12 = vmul.f32 %v71_v10, %v63_v7  ;;  %v75_v13 = vadd.f32 %v71_v10, %v63_v7 }
  0x3a   :  { %v74_v14 = vmul.f32 %v72_v11, %v64_v9  ;;  %v76_v15 = vadd.f32 %v72_v11, %v64_v9 }
  0x3c   :  { %v78_v16 = vadd.f32 %v74_v14, %v73_v12  ;;  %v82_v17 = vadd.f32 %v76_v15, %v75_v13 }
  0x3e   :  { %89 = vst [vmem:[#allocation9] sm:$0xff] %v78_v16  ;;  %91 = vst [vmem:[#allocation10] sm:$0xff] %v82_v17 }
  0x3f   :  { %187 = shalt.err (!%p184_p6)
}
  0x40   :  { %s188_s16 = scalar_lea.hbm %s304_s2, 128 }
  0x41   :  { %p189_p7 = scmp.ne.s32.totalorder %s304_s2, %s188_s16  ;;  %p192_p8 = scmp.lt.u32.totalorder %s188_s16, %s304_s2 }
  0x43   :  { %p194_p9 = pnand %p192_p8, %p189_p7 }
  0x45   :  { %197 = shalt.err (!%p194_p9)
}
  0x46   :  { %101 = dma.vmem_to_hbm [thread:$0]  %s99_s10, 128, %s304_s2, [#allocation6]  }
  0x47   :  { %s198_s23 = scalar_lea.vmem %s109_s12, 128  ;;  %p203_p11 = scmp.lt.s32.totalorder %s109_s12, %s109_s12 }
  0x48   :  { %p199_p10 = scmp.ne.s32.totalorder %s109_s12, %s198_s23  ;;  %p204_p12 = scmp.lt.s32.totalorder %s198_s23, %s198_s23 }
  0x4a   :  { %p205_p13 = por %p204_p12, %p203_p11 }
  0x4c   :  { %p206_p0 = pnand %p205_p13, %p199_p10 }
  0x4e   :  { %209 = shalt.err (!%p206_p0)
}
  0x4f   :  { %s210_s26 = scalar_lea.hbm %s305_s3, 128 }
  0x50   :  { %p211_p1 = scmp.ne.s32.totalorder %s305_s3, %s210_s26  ;;  %p214_p2 = scmp.lt.u32.totalorder %s210_s26, %s305_s3 }
  0x52   :  { %p216_p3 = pnand %p214_p2, %p211_p1 }
  0x54   :  { %219 = shalt.err (!%p216_p3)
}
  0x55   :  { %111 = dma.vmem_to_hbm [thread:$0]  %s109_s12, 128, %s305_s3, [#allocation11]  }
  0x56   :  { %224 = dma.done.wait [#allocation6], 128  }
  0x57   :  { %225 = vsyncadd [#allocation6], 4294967168 }
  0x58   :  { %226 = dma.done.wait [#allocation11], 128  }
  0x59   :  { %227 = vsyncadd [#allocation11], 4294967168 }
  0x5a   :  { %118 = vsyncpa [#allocation5], 1 }
  0x5b   :  { %119 = vsyncpa [#allocation8], 1 }
  0x5c   :  { %120 = vsyncpa [#allocation6], 1 }
  0x5d   :  { %121 = vsyncpa [#allocation11], 1 }

</bundles_post_ra>
